<compile_context>
chip_gen: v7x
topology: tpu7x:2x2x1
jax: 0.10.0
libtpu: 0.0.40
codegen_flags: <defaults>
</compile_context>

<pallas_src>
import jax
import jax.numpy as jnp
from jax.experimental import pallas as pl
from jax.experimental.pallas import tpu as pltpu

EPS = 1e-5


def _trans_kernel(x_ref, scale_ref, bias_ref, w_ref, o_ref):
    # x_ref:     (4, Cin_f, TS)   4 pool taps x fused (branch*Cin) x pooled-spatial tile
    # scale_ref: (Cin_f, 1)       folded BN scale  = gamma / sqrt(var + eps)   (f32)
    # bias_ref:  (Cin_f, 1)       folded BN bias   = beta - mean * scale        (f32)
    # w_ref:     (Cout_f, Cin_f)  block-diagonal 1x1 conv weight * 0.25 (pool factor)
    # o_ref:     (Cout_f, TS)     lane-dense output tile (f32)
    x = x_ref[...]                                                  # bf16 or f32
    y = jnp.maximum(x * scale_ref[...] + bias_ref[...], 0.0)        # BN + ReLU in f32 (VPU)
    p = (y[0] + y[1] + y[2] + y[3]).astype(w_ref.dtype)             # 2x2 avg pool: 3 adds
    o_ref[...] = jnp.dot(w_ref[...], p,                             # fused 1x1 convs (MXU)
                         preferred_element_type=jnp.float32)


def _pick_tile(s):
    for t in (2048, 1024, 512, 256, 128):
        if s >= t and s % t == 0:
            return t
    return s


def trans_block_pallas(xs_nchw, gamma, beta, run_mean, run_var, conv_w_oihw,
                       compute_dtype=jnp.float32):
    """xs_nchw: (branch, N, Cin, H, W) -> (branch, N, Cout, H//2, W//2)."""
    B, N, Cin, H, W = xs_nchw.shape
    Cout = conv_w_oihw.shape[1]
    Hp, Wp = H // 2, W // 2
    S = N * Hp * Wp                      # pooled-spatial columns (minor, lane dim)
    Cin_f, Cout_f = B * Cin, B * Cout    # fused channel dims
    TS = _pick_tile(S)                   # column tile -> grid axis ("parallel")

    # ---- glue: parameter folding + layout plumbing (plain JAX) ----
    scale = (gamma / jnp.sqrt(run_var + EPS)).astype(jnp.float32)          # (B, Cin)
    bias = (beta - run_mean * scale).astype(jnp.float32)                   # (B, Cin)
    scale = scale.reshape(Cin_f, 1)
    bias = bias.reshape(Cin_f, 1)

    # Block-diagonal fused conv weight (B*Cout, B*Cin), 1/4 pool factor folded in.
    w2d = conv_w_oihw[..., 0, 0].astype(jnp.float32)                       # (B, Cout, Cin)
    w_bd = (jnp.eye(B, dtype=jnp.float32)[:, None, :, None]
            * w2d[:, :, None, :]).reshape(Cout_f, Cin_f) * 0.25
    w_bd = w_bd.astype(compute_dtype)

    # Pack x to (4, B*Cin, N*Hp*Wp); axis 0 enumerates the 2x2-window taps.
    xs = xs_nchw[..., :2 * Hp, :2 * Wp]            # floor-crop like avg_pool2d(., 2)
    xp = xs.reshape(B, N, Cin, Hp, 2, Wp, 2)
    xp = jnp.transpose(xp, (4, 6, 0, 2, 1, 3, 5))  # (2, 2, B, Cin, N, Hp, Wp)
    xp = xp.reshape(4, Cin_f, S).astype(compute_dtype)

    ebytes = jnp.dtype(compute_dtype).itemsize
    cost = pl.CostEstimate(
        flops=2 * Cout_f * Cin_f * S + 15 * Cin_f * S,     # conv matmul + BN/ReLU/pool
        transcendentals=0,
        bytes_accessed=(xp.size * ebytes + w_bd.size * ebytes
                        + (scale.size + bias.size) * 4 + Cout_f * S * 4),
    )

    out = pl.pallas_call(
        _trans_kernel,
        out_shape=jax.ShapeDtypeStruct((Cout_f, S), jnp.float32),
        grid=(S // TS,),
        in_specs=[
            pl.BlockSpec((4, Cin_f, TS), lambda j: (0, 0, j)),
            pl.BlockSpec((Cin_f, 1), lambda j: (0, 0)),       # loop-invariant
            pl.BlockSpec((Cin_f, 1), lambda j: (0, 0)),       # loop-invariant
            pl.BlockSpec((Cout_f, Cin_f), lambda j: (0, 0)),  # loop-invariant
        ],
        out_specs=pl.BlockSpec((Cout_f, TS), lambda j: (0, j)),
        compiler_params=pltpu.CompilerParams(
            dimension_semantics=("parallel",),
            vmem_limit_bytes=32 * 1024 * 1024),
        cost_estimate=cost,
    )(xp, scale, bias, w_bd)

    # (B*Cout, N*Hp*Wp) -> (B, N, Cout, Hp, Wp)  (NCHW per branch)
    out = out.reshape(B, Cout, N, Hp, Wp)
    return jnp.transpose(out, (0, 2, 1, 3, 4))


def trans_block_forward(x, params, compute_dtype=jnp.float32):
    """Mirrors TransBlock.forward: x = (x1, x2, x3, x4, pred)."""
    x1, x2, x3, x4, pred = x
    xs = jnp.stack([x1, x2, x3, x4], axis=0)
    ys = trans_block_pallas(xs, *params, compute_dtype=compute_dtype)
    return (ys[0], ys[1], ys[2], ys[3], pred)


def ref_forward(xs_nchw, gamma, beta, run_mean, run_var, conv_w_oihw):
    """Pure-JAX reference of the same math (BN eval + ReLU + 1x1 conv + avgpool2)."""
    scale = gamma / jnp.sqrt(run_var + EPS)
    bias = beta - run_mean * scale
    y = jnp.maximum(xs_nchw * scale[:, None, :, None, None]
                    + bias[:, None, :, None, None], 0.0)
    z = jnp.einsum('bnchw,boc->bnohw', y, conv_w_oihw[..., 0, 0])
    B, N, Co, H, W = z.shape
    return z.reshape(B, N, Co, H // 2, 2, W // 2, 2).mean(axis=(4, 6))


if __name__ == "__main__":
    branch, N, indepth, H, W = 4, 2, 4, 16, 16
    exp = 2                       # TransBlock.exp
    outdepth = indepth * exp

    key = jax.random.PRNGKey(0)
    k = jax.random.split(key, 7)
    xs = jax.random.normal(k[0], (branch, N, indepth, H, W), jnp.float32)
    pred = jax.random.normal(k[1], (N, outdepth), jnp.float32)
    gamma = 0.5 + jax.random.uniform(k[2], (branch, indepth), jnp.float32)
    beta = 0.1 * jax.random.normal(k[3], (branch, indepth), jnp.float32)
    run_mean = 0.1 * jax.random.normal(k[4], (branch, indepth), jnp.float32)
    run_var = 0.5 + jax.random.uniform(k[5], (branch, indepth), jnp.float32)
    conv_w = jax.random.normal(k[6], (branch, outdepth, indepth, 1, 1),
                               jnp.float32) / jnp.sqrt(float(indepth))

    params = (gamma, beta, run_mean, run_var, conv_w)
    x_tuple = (xs[0], xs[1], xs[2], xs[3], pred)
    ref = ref_forward(xs, *params)

    # f32 path: strict check.
    y1, y2, y3, y4, pred_out = trans_block_forward(x_tuple, params)
    jax.block_until_ready((y1, y2, y3, y4, pred_out))
    got = jnp.stack([y1, y2, y3, y4], axis=0)
    assert got.shape == (branch, N, outdepth, H // 2, W // 2), got.shape
    assert jnp.allclose(got, ref, rtol=1e-4, atol=1e-4), \
        float(jnp.max(jnp.abs(got - ref)))
    assert jnp.array_equal(pred_out, pred)

    # bf16 input/weight path (v6e/v7x DMA saving); loose tolerance vs f32 ref.
    yb = trans_block_forward(x_tuple, params, compute_dtype=jnp.bfloat16)
    jax.block_until_ready(yb)
    got_bf16 = jnp.stack(yb[:4], axis=0)
    assert jnp.allclose(got_bf16, ref, rtol=5e-2, atol=2.5e-1), \
        float(jnp.max(jnp.abs(got_bf16 - ref)))

    print("KERNEL_OK")
</pallas_src>

<mosaic_0001>
module attributes {stable_mosaic.version = 11 : i64} {
  func.func @_trans_kernel(%arg0: i32, %arg1: memref<4x16x128xf32, #tpu.memory_space<vmem>>, %arg2: memref<16x1xf32, #tpu.memory_space<vmem>>, %arg3: memref<16x1xf32, #tpu.memory_space<vmem>>, %arg4: memref<32x16xf32, #tpu.memory_space<vmem>>, %arg5: memref<32x128xf32, #tpu.memory_space<vmem>>) attributes {dimension_semantics = [#tpu.dimension_semantics<parallel>], iteration_bounds = array<i64: 1>, scalar_prefetch = 0 : i64, scratch_operands = 0 : i64, tpu.core_type = #tpu.core_type<tc>, window_params = [{transform_indices = @transform_0, window_bounds = array<i64: 4, 16, 128>}, {pipeline_mode = #tpu.pipeline_mode<synchronous>, transform_indices = @transform_1, window_bounds = array<i64: 16, 1>}, {pipeline_mode = #tpu.pipeline_mode<synchronous>, transform_indices = @transform_2, window_bounds = array<i64: 16, 1>}, {pipeline_mode = #tpu.pipeline_mode<synchronous>, transform_indices = @transform_3, window_bounds = array<i64: 32, 16>}, {transform_indices = @transform_4, window_bounds = array<i64: 32, 128>}]} {
    %c0 = arith.constant 0 : index
    %c0_0 = arith.constant 0 : index
    %c0_1 = arith.constant 0 : index
    %0 = vector.load %arg1[%c0, %c0_0, %c0_1] : memref<4x16x128xf32, #tpu.memory_space<vmem>>, vector<4x16x128xf32>
    %c0_2 = arith.constant 0 : index
    %c0_3 = arith.constant 0 : index
    %1 = vector.load %arg2[%c0_2, %c0_3] : memref<16x1xf32, #tpu.memory_space<vmem>>, vector<16x1xf32>
    %2 = vector.shape_cast %1 : vector<16x1xf32> to vector<1x16x1xf32>
    %3 = vector.broadcast %2 : vector<1x16x1xf32> to vector<4x16x128xf32>
    %4 = arith.mulf %0, %3 : vector<4x16x128xf32>
    %c0_4 = arith.constant 0 : index
    %c0_5 = arith.constant 0 : index
    %5 = vector.load %arg3[%c0_4, %c0_5] : memref<16x1xf32, #tpu.memory_space<vmem>>, vector<16x1xf32>
    %6 = vector.shape_cast %5 : vector<16x1xf32> to vector<1x16x1xf32>
    %7 = vector.broadcast %6 : vector<1x16x1xf32> to vector<4x16x128xf32>
    %8 = arith.addf %4, %7 : vector<4x16x128xf32>
    %cst = arith.constant 0.000000e+00 : f32
    %9 = vector.broadcast %cst : f32 to vector<4x16x128xf32>
    %10 = arith.maximumf %8, %9 : vector<4x16x128xf32>
    %11 = vector.extract_strided_slice %10 {offsets = [0, 0, 0], sizes = [1, 16, 128], strides = [1, 1, 1]} : vector<4x16x128xf32> to vector<1x16x128xf32>
    %12 = vector.shape_cast %11 : vector<1x16x128xf32> to vector<16x128xf32>
    %13 = vector.extract_strided_slice %10 {offsets = [1, 0, 0], sizes = [1, 16, 128], strides = [1, 1, 1]} : vector<4x16x128xf32> to vector<1x16x128xf32>
    %14 = vector.shape_cast %13 : vector<1x16x128xf32> to vector<16x128xf32>
    %15 = arith.addf %12, %14 : vector<16x128xf32>
    %16 = vector.extract_strided_slice %10 {offsets = [2, 0, 0], sizes = [1, 16, 128], strides = [1, 1, 1]} : vector<4x16x128xf32> to vector<1x16x128xf32>
    %17 = vector.shape_cast %16 : vector<1x16x128xf32> to vector<16x128xf32>
    %18 = arith.addf %15, %17 : vector<16x128xf32>
    %19 = vector.extract_strided_slice %10 {offsets = [3, 0, 0], sizes = [1, 16, 128], strides = [1, 1, 1]} : vector<4x16x128xf32> to vector<1x16x128xf32>
    %20 = vector.shape_cast %19 : vector<1x16x128xf32> to vector<16x128xf32>
    %21 = arith.addf %18, %20 : vector<16x128xf32>
    %c0_6 = arith.constant 0 : index
    %c0_7 = arith.constant 0 : index
    %22 = vector.load %arg4[%c0_6, %c0_7] : memref<32x16xf32, #tpu.memory_space<vmem>>, vector<32x16xf32>
    %cst_8 = arith.constant dense<0.000000e+00> : vector<32x128xf32>
    %23 = tpu.matmul %22, %21, %cst_8 {dimension_numbers = #tpu.dot_dimension_numbers<[1], [0], [0], [1], [0, 0, 1, 1], [], []>} : vector<32x16xf32>, vector<16x128xf32>, vector<32x128xf32> -> vector<32x128xf32>
    %c0_9 = arith.constant 0 : index
    %c0_10 = arith.constant 0 : index
    %24 = vector.load %arg5[%c0_9, %c0_10] : memref<32x128xf32, #tpu.memory_space<vmem>>, vector<32x128xf32>
    tpu.vector_store %arg5[%c0_9, %c0_10], %23 {strides = array<i32>} : memref<32x128xf32, #tpu.memory_space<vmem>>, vector<32x128xf32>,
    return
  }
  func.func @transform_0(%arg0: i32) -> (i32, i32, i32) {
    %c0_i32 = arith.constant 0 : i32
    %c0_i32_0 = arith.constant 0 : i32
    %c0_i32_1 = arith.constant 0 : i32
    return %c0_i32, %c0_i32_0, %arg0 : i32, i32, i32
  }
  func.func @transform_1(%arg0: i32) -> (i32, i32) {
    %c0_i32 = arith.constant 0 : i32
    %c0_i32_0 = arith.constant 0 : i32
    %c0_i32_1 = arith.constant 0 : i32
    return %c0_i32, %c0_i32_0 : i32, i32
  }
  func.func @transform_2(%arg0: i32) -> (i32, i32) {
    %c0_i32 = arith.constant 0 : i32
    %c0_i32_0 = arith.constant 0 : i32
    %c0_i32_1 = arith.constant 0 : i32
    return %c0_i32, %c0_i32_0 : i32, i32
  }
  func.func @transform_3(%arg0: i32) -> (i32, i32) {
    %c0_i32 = arith.constant 0 : i32
    %c0_i32_0 = arith.constant 0 : i32
    %c0_i32_1 = arith.constant 0 : i32
    return %c0_i32, %c0_i32_0 : i32, i32
  }
  func.func @transform_4(%arg0: i32) -> (i32, i32) {
    %c0_i32 = arith.constant 0 : i32
    %c0_i32_0 = arith.constant 0 : i32
    return %c0_i32, %arg0 : i32, i32
  }
}

</mosaic_0001>

<bundles_post_ra>
// kernel: tpu_custom_call.1
= control target key start
LH: loop header
LB: loop body
LE: loop exit
PB: predicated region body
PF: predicated region fallthrough
CT: control target
= control target key end

     0   :  { %v258_v2 = vmov 0   ;;  %s351_s0 = inlined_call_operand.vmem [shape: f32[4,16,128], index: 0, kind: input, shape index: {}]   ;;  %s352_s1 = inlined_call_operand.vmem [shape: f32[16,1], index: 1, kind: input, shape index: {}]   ;;  %s353_s2 = inlined_call_operand.vmem [shape: f32[16,1], index: 2, kind: input, shape index: {}]   ;;  %s354_s3 = inlined_call_operand.vmem [shape: f32[32,16], index: 3, kind: input, shape index: {}]   ;;  %s355_s4 = inlined_call_operand.hbm [shape: f32[32,128], index: 4, kind: output, shape index: {}]  }
   0x1   :  { %v46_v0 = vld [vmem:[%s353_s2] sm:$0xff]  ;;  %233 = vset.pattern.permute.xlu1 %v258_v2  ;;  %232 = vset.pattern.permute.xlu0 %v258_v2 }
   0x2   :  { %v26_v1 = vld [vmem:[%s352_s1] sm:$0xff]  ;;  %50 = vperm.xlu1 %233, %v46_v0  }
   0x3   :  { %30 = vperm.xlu0 %232, %v26_v1  }
   0x4   :  { %9 = vsyncpa [#allocation3], 0  ;;  %v47_v3 = vld [vmem:[%s353_s2 + $0x8] sm:$0xff]  ;;  %v80_v5 = vld [vmem:[%s354_s3] sm:$0xff]  ;;  %vm84_vm0 = vcmask 130048   ;;  %s259_s18 = smov [#allocation2]  }
   0x5   :  { %v27_v4 = vld [vmem:[%s352_s1 + $0x8] sm:$0xff]  ;;  %v82_v6 = vld [vmem:[%s354_s3 + $0x10] sm:$0xff]  ;;  %216 = vmatprep.mubr.msk.f32.mxu0 %vm84_vm0, %v80_v5  ;;  %v18_v7 = vld [vmem:[%s351_s0] sm:$0xff]  ;;  %s191_s19 = sshll.u32 %s259_s18, 4  ;;  %s192_s19 = int_to_ptr.vmem [resolvable:$true] %s191_s19 }
   0x6   :  { %55 = vperm.xlu1 %233, %v47_v3   ;;  %219 = vmatprep.mubr.msk.f32.mxu1 %vm84_vm0, %v82_v6  ;;  %v20_v8 = vld [vmem:[%s351_s0 + $0x10] sm:$0xff]  ;;  %v22_v9 = vld [vmem:[%s351_s0 + $0x20] sm:$0xff]  ;;  %v19_v16 = vld [vmem:[%s351_s0 + $0x8] sm:$0xff]  ;;  %s234_s20 = scalar_lea.vmem %s192_s19, 512  ;;  %p239_p1 = scmp.lt.s32.totalorder %s192_s19, %s192_s19 }
   0x7   :  { %35 = vperm.xlu0 %232, %v27_v4   ;;  %v24_v15 = vld [vmem:[%s351_s0 + $0x30] sm:$0xff]  ;;  %v21_v19 = vld [vmem:[%s351_s0 + $0x18] sm:$0xff]  ;;  %v23_v20 = vld [vmem:[%s351_s0 + $0x28] sm:$0xff]  ;;  %p235_p0 = scmp.ne.s32.totalorder %s192_s19, %s234_s20  ;;  %p240_p2 = scmp.lt.s32.totalorder %s234_s20, %s234_s20 }
   0x8   :  { %v25_v21 = vld [vmem:[%s351_s0 + $0x38] sm:$0xff]  ;;  %v81_v50 = vld [vmem:[%s354_s3 + $0x8] sm:$0xff] }
   0x9   :  { %v83_v51 = vld [vmem:[%s354_s3 + $0x18] sm:$0xff]  ;;  %p241_p3 = por %p240_p2, %p239_p1 }
   0xb   :  { %p242_p4 = pnand %p241_p3, %p235_p0 }
  0x81   :  { %v51_v11 = vpop.permute.xlu1 %50 }
  0x82   :  { %v31_v10 = vpop.permute.xlu0 %30 }
  0x83   :  { %v38_v12 = vmul.f32 %v31_v10, %v18_v7  ;;  %v40_v13 = vmul.f32 %v31_v10, %v20_v8  ;;  %v42_v14 = vmul.f32 %v31_v10, %v22_v9  ;;  %v44_v23 = vmul.f32 %v31_v10, %v24_v15 }
  0x85   :  { %v58_v17 = vadd.f32 %v51_v11, %v38_v12  ;;  %v60_v18 = vadd.f32 %v51_v11, %v40_v13  ;;  %v62_v24 = vadd.f32 %v51_v11, %v42_v14  ;;  %v56_v31 = vpop.permute.xlu1 %55  ;;  %v64_v36 = vadd.f32 %v51_v11, %v44_v23 }
  0x86   :  { %v36_v22 = vpop.permute.xlu0 %35 }
  0x87   :  { %v66_v25 = vmax.f32 %v58_v17, 0.0  ;;  %v68_v26 = vmax.f32 %v60_v18, 0.0  ;;  %v39_v27 = vmul.f32 %v36_v22, %v19_v16  ;;  %v41_v28 = vmul.f32 %v36_v22, %v21_v19 }
  0x88   :  { %v43_v29 = vmul.f32 %v36_v22, %v23_v20  ;;  %v45_v30 = vmul.f32 %v36_v22, %v25_v21  ;;  %v70_v37 = vmax.f32 %v62_v24, 0.0  ;;  %v72_v44 = vmax.f32 %v64_v36, 0.0 }
  0x89   :  { %v74_v32 = vadd.f32 %v68_v26, %v66_v25  ;;  %v59_v33 = vadd.f32 %v56_v31, %v39_v27  ;;  %v61_v34 = vadd.f32 %v56_v31, %v41_v28 }
  0x8a   :  { %v63_v35 = vadd.f32 %v56_v31, %v43_v29  ;;  %v65_v38 = vadd.f32 %v56_v31, %v45_v30 }
  0x8b   :  { %v67_v39 = vmax.f32 %v59_v33, 0.0  ;;  %v69_v40 = vmax.f32 %v61_v34, 0.0  ;;  %v76_v41 = vadd.f32 %v74_v32, %v70_v37 }
  0x8c   :  { %v71_v42 = vmax.f32 %v63_v35, 0.0  ;;  %v73_v45 = vmax.f32 %v65_v38, 0.0 }
  0x8d   :  { %v75_v43 = vadd.f32 %v69_v40, %v67_v39  ;;  %v78_v48 = vadd.f32 %v76_v41, %v72_v44 }
  0x8f   :  { %v77_v46 = vadd.f32 %v75_v43, %v71_v42 }
  0x91   :  { %v79_v47 = vadd.f32 %v77_v46, %v73_v45 }
  0x93   :  { %v222_v49 = vpack.c.bf16 %v79_v47, %v78_v48 }
  0x95   :  { %223 = vmatprep.subr.bf16.mxu0 %v222_v49  ;;  %226 = vmatprep.subr.bf16.mxu1 %v222_v49 }
  0x96   :  { %225 = vmatpush3.bf16.msra.mxu0 %v222_v49  ;;  %227 = vmatpush3.bf16.msra.mxu1 %v222_v49 }
  0x99   :  { %217 = vmatmul.mubr.msk.f32.vlgmr.msra.gmra.mrb[0].mxu0 %vm84_vm0, %v81_v50  ;;  %220 = vmatmul.mubr.msk.f32.vlgmr.msra.gmra.mrb[0].mxu1 %vm84_vm0, %v83_v51 }
 0x16c   :  { %v218_v52 = vpop.f32.mrb[0].mxu0  ;;  %v221_v53 = vpop.f32.mrb[0].mxu1 }
 0x16d   :  { %183 = vst [vmem:[#allocation2 + $0x8] sm:$0xff] %v218_v52  ;;  %185 = vst [vmem:[#allocation2 + $0x18] sm:$0xff] %v221_v53  ;;  %v163_v54 = vpop.f32.mrb[1].mxu0  ;;  %v173_v55 = vpop.f32.mrb[1].mxu1 }
 0x16e   :  { %182 = vst [vmem:[#allocation2] sm:$0xff] %v163_v54  ;;  %184 = vst [vmem:[#allocation2 + $0x10] sm:$0xff] %v173_v55 }
 0x16f   :  { %245 = shalt.err (!%p242_p4)
}
 0x170   :  { %s246_s22 = scalar_lea.hbm %s355_s4, 512 }
 0x171   :  { %p247_p5 = scmp.ne.s32.totalorder %s355_s4, %s246_s22  ;;  %p250_p6 = scmp.lt.u32.totalorder %s246_s22, %s355_s4 }
 0x173   :  { %p252_p7 = pnand %p250_p6, %p247_p5 }
 0x175   :  { %255 = shalt.err (!%p252_p7)
}
 0x176   :  { %s260_s2 = smov 128   ;;  %s261_s27 = smov 8  }
 0x177   :  { %197 = dma.vmem_to_hbm [thread:$0]  %s192_s19, 512, %s355_s4, [#allocation3], %s260_s2, %s260_s2, %s261_s27  }
 0x178   :  { %256 = dma.done.wait [#allocation3], 512  }
 0x179   :  { %257 = vsyncadd [#allocation3], 4294966784 }
 0x17a   :  { %201 = vsyncpa [#allocation3], 1 }

</bundles_post_ra>
